<compile_context>
chip_gen: v7x
topology: tpu7x:2x2x1
jax: 0.10.0
libtpu: 0.0.40
codegen_flags: <defaults>
</compile_context>

<pallas_src>
import jax
import jax.numpy as jnp
from jax.experimental import pallas as pl
from jax.experimental.pallas import tpu as pltpu


_HIDDEN = 128      # Linear(input_dim -> 128)
_N_CLASSES = 2     # Linear(128 -> 2)
_W2_PAD = 128      # lane-dense width for the 2nd matmul (compute-only; never stored)


def _round_up(x, m):
    return ((x + m - 1) // m) * m


def _mlp_kernel(x_ref, w1_ref, b1_ref, w2_ref, b2_ref, o_ref):
    # x_ref:  (TB, D)   f32   -- cast to bf16 on-chip right before the MXU
    # w1_ref: (D, H)    bf16    b1_ref: (1, H)    f32
    # w2_ref: (H, 128)  bf16    b2_ref: (1, 128)  f32   (zero-padded cols 2..127)
    # o_ref:  (TB, 2)   f32   -- only the real logits hit HBM
    xb = x_ref[...].astype(jnp.bfloat16)                       # free VPU cast under DMA
    h = jnp.dot(xb, w1_ref[...], preferred_element_type=jnp.float32)
    h = jnp.maximum(h + b1_ref[...], 0.0)                      # bias add + ReLU in f32
    # Dropout(p=0.3) == identity (inference semantics).
    out = jnp.dot(h.astype(jnp.bfloat16), w2_ref[...],
                  preferred_element_type=jnp.float32) + b2_ref[...]
    o_ref[...] = out[:, : o_ref.shape[-1]].astype(o_ref.dtype)  # store only real logits


def session_classifier_forward(x, w1, b1, w2, b2, *, block_b=4096):
    """x: [B, input_dim] float32 -> logits [B, 2] float32."""
    x = x.astype(jnp.float32)
    B, D = x.shape
    H = w1.shape[1]
    O = w2.shape[1]

    # Batch tile: multiple of 16 (bf16 (16,128) packing). No padding of x: the grid
    # uses cdiv and Pallas clips the partial last tile at the boundary.
    B16 = _round_up(B, 16)
    TB = min(_round_up(max(block_b, 16), 16), B16)
    # v7x has 2 TensorCores: if the whole batch fits one tile, split it so the
    # "parallel" batch axis actually shards across both cores.
    if TB >= B16 and B16 > 16:
        TB = _round_up(B16 // 2, 16)
    grid = (pl.cdiv(B, TB),)

    # Weights / biases are tiny and read once per call: cast/pad in the wrapper.
    w1b = w1.astype(jnp.bfloat16)
    b1f = b1.reshape(1, H).astype(jnp.float32)
    w2b = jnp.pad(w2.astype(jnp.bfloat16), ((0, 0), (0, _W2_PAD - O)))
    b2f = jnp.pad(b2.reshape(1, O).astype(jnp.float32), ((0, 0), (0, _W2_PAD - O)))

    cost = pl.CostEstimate(
        flops=2 * B * (D * H + H * _W2_PAD),
        transcendentals=0,
        bytes_accessed=(x.size * 4 + w1b.size * 2 + b1f.size * 4
                        + w2b.size * 2 + b2f.size * 4 + B * O * 4),
    )

    out = pl.pallas_call(
        _mlp_kernel,
        out_shape=jax.ShapeDtypeStruct((B, O), jnp.float32),
        grid=grid,
        in_specs=[
            pl.BlockSpec((TB, D), lambda i: (i, 0)),          # x: batch-tiled, f32 in HBM
            pl.BlockSpec((D, H), lambda i: (0, 0)),           # W1: VMEM-resident
            pl.BlockSpec((1, H), lambda i: (0, 0)),           # b1: VMEM-resident
            pl.BlockSpec((H, _W2_PAD), lambda i: (0, 0)),     # W2 (lane-padded)
            pl.BlockSpec((1, _W2_PAD), lambda i: (0, 0)),     # b2 (lane-padded)
        ],
        out_specs=pl.BlockSpec((TB, O), lambda i: (i, 0)),    # last dim == full dim (2)
        compiler_params=pltpu.CompilerParams(
            dimension_semantics=("parallel",),                # megacore shards batch tiles
        ),
        cost_estimate=cost,
    )(x, w1b, b1f, w2b, b2f)

    return out


def init_params(key, input_dim=256, hidden=_HIDDEN, n_classes=_N_CLASSES):
    """Deterministic synthetic init (matches nn.Linear shapes, stored as [in, out])."""
    k1, k2, k3, k4 = jax.random.split(key, 4)
    s1 = 1.0 / jnp.sqrt(input_dim)
    s2 = 1.0 / jnp.sqrt(hidden)
    w1 = jax.random.uniform(k1, (input_dim, hidden), jnp.float32, -s1, s1)
    b1 = jax.random.uniform(k2, (1, hidden), jnp.float32, -s1, s1)
    w2 = jax.random.uniform(k3, (hidden, n_classes), jnp.float32, -s2, s2)
    b2 = jax.random.uniform(k4, (1, n_classes), jnp.float32, -s2, s2)
    return w1, b1, w2, b2


if __name__ == "__main__":
    key = jax.random.PRNGKey(0)
    kx, kp = jax.random.split(key)

    # B=40: non-multiple of 16/TB so boundary clipping is exercised.
    B, D = 40, 256
    x = jax.random.normal(kx, (B, D), jnp.float32)
    w1, b1, w2, b2 = init_params(kp, input_dim=D)

    # Small tile: 3-step grid with a partial last tile.
    logits_small = session_classifier_forward(x, w1, b1, w2, b2, block_b=16)
    # Default tile: batch split into 2 tiles (v7x two-TensorCore path).
    logits = session_classifier_forward(x, w1, b1, w2, b2)
    jax.block_until_ready((logits_small, logits))
    assert logits.shape == (B, _N_CLASSES)
    assert logits_small.shape == (B, _N_CLASSES)

    # Reference with matching bf16-input / f32-accumulate numerics.
    xb = x.astype(jnp.bfloat16)
    w1b = w1.astype(jnp.bfloat16)
    w2b = w2.astype(jnp.bfloat16)
    h_ref = jnp.maximum(jnp.dot(xb, w1b, preferred_element_type=jnp.float32) + b1, 0.0)
    ref = jnp.dot(h_ref.astype(jnp.bfloat16), w2b, preferred_element_type=jnp.float32) + b2
    assert jnp.allclose(logits, ref, atol=1e-3, rtol=1e-3)
    assert jnp.allclose(logits_small, ref, atol=1e-3, rtol=1e-3)

    # Sanity vs pure-f32 module semantics (looser tolerance due to bf16 MXU inputs).
    ref_f32 = jnp.maximum(x @ w1 + b1, 0.0) @ w2 + b2
    assert jnp.allclose(logits, ref_f32, atol=5e-2, rtol=5e-2)

    print("KERNEL_OK")
</pallas_src>

<mosaic_0001>
module attributes {stable_mosaic.version = 11 : i64} {
  func.func @_mlp_kernel(%arg0: i32, %arg1: memref<16x256xf32, #tpu.memory_space<vmem>>, %arg2: memref<256x128xbf16, #tpu.memory_space<vmem>>, %arg3: memref<1x128xf32, #tpu.memory_space<vmem>>, %arg4: memref<128x128xbf16, #tpu.memory_space<vmem>>, %arg5: memref<1x128xf32, #tpu.memory_space<vmem>>, %arg6: memref<16x2xf32, #tpu.memory_space<vmem>>) attributes {dimension_semantics = [#tpu.dimension_semantics<parallel>], iteration_bounds = array<i64: 3>, scalar_prefetch = 0 : i64, scratch_operands = 0 : i64, tpu.core_type = #tpu.core_type<tc>, window_params = [{transform_indices = @transform_0, window_bounds = array<i64: 16, 256>}, {pipeline_mode = #tpu.pipeline_mode<synchronous>, transform_indices = @transform_1, window_bounds = array<i64: 256, 128>}, {pipeline_mode = #tpu.pipeline_mode<synchronous>, transform_indices = @transform_2, window_bounds = array<i64: 1, 128>}, {pipeline_mode = #tpu.pipeline_mode<synchronous>, transform_indices = @transform_3, window_bounds = array<i64: 128, 128>}, {pipeline_mode = #tpu.pipeline_mode<synchronous>, transform_indices = @transform_4, window_bounds = array<i64: 1, 128>}, {transform_indices = @transform_5, window_bounds = array<i64: 16, 2>}]} {
    %c0 = arith.constant 0 : index
    %c0_0 = arith.constant 0 : index
    %0 = vector.load %arg1[%c0, %c0_0] : memref<16x256xf32, #tpu.memory_space<vmem>>, vector<16x256xf32>
    %1 = arith.truncf %0 : vector<16x256xf32> to vector<16x256xbf16>
    %c0_1 = arith.constant 0 : index
    %c0_2 = arith.constant 0 : index
    %2 = vector.load %arg2[%c0_1, %c0_2] : memref<256x128xbf16, #tpu.memory_space<vmem>>, vector<256x128xbf16>
    %cst = arith.constant dense<0.000000e+00> : vector<16x128xf32>
    %3 = tpu.matmul %1, %2, %cst {dimension_numbers = #tpu.dot_dimension_numbers<[1], [0], [0], [1], [0, 0, 1, 1], [], []>} : vector<16x256xbf16>, vector<256x128xbf16>, vector<16x128xf32> -> vector<16x128xf32>
    %c0_3 = arith.constant 0 : index
    %c0_4 = arith.constant 0 : index
    %4 = vector.load %arg3[%c0_3, %c0_4] : memref<1x128xf32, #tpu.memory_space<vmem>>, vector<1x128xf32>
    %5 = vector.broadcast %4 : vector<1x128xf32> to vector<16x128xf32>
    %6 = arith.addf %3, %5 : vector<16x128xf32>
    %cst_5 = arith.constant 0.000000e+00 : f32
    %7 = vector.broadcast %cst_5 : f32 to vector<16x128xf32>
    %8 = arith.maximumf %6, %7 : vector<16x128xf32>
    %9 = arith.truncf %8 : vector<16x128xf32> to vector<16x128xbf16>
    %c0_6 = arith.constant 0 : index
    %c0_7 = arith.constant 0 : index
    %10 = vector.load %arg4[%c0_6, %c0_7] : memref<128x128xbf16, #tpu.memory_space<vmem>>, vector<128x128xbf16>
    %cst_8 = arith.constant dense<0.000000e+00> : vector<16x128xf32>
    %11 = tpu.matmul %9, %10, %cst_8 {dimension_numbers = #tpu.dot_dimension_numbers<[1], [0], [0], [1], [0, 0, 1, 1], [], []>} : vector<16x128xbf16>, vector<128x128xbf16>, vector<16x128xf32> -> vector<16x128xf32>
    %c0_9 = arith.constant 0 : index
    %c0_10 = arith.constant 0 : index
    %12 = vector.load %arg5[%c0_9, %c0_10] : memref<1x128xf32, #tpu.memory_space<vmem>>, vector<1x128xf32>
    %13 = vector.broadcast %12 : vector<1x128xf32> to vector<16x128xf32>
    %14 = arith.addf %11, %13 : vector<16x128xf32>
    %15 = vector.extract_strided_slice %14 {offsets = [0, 0], sizes = [16, 2], strides = [1, 1]} : vector<16x128xf32> to vector<16x2xf32>
    %c0_11 = arith.constant 0 : index
    %c0_12 = arith.constant 0 : index
    %16 = vector.load %arg6[%c0_11, %c0_12] : memref<16x2xf32, #tpu.memory_space<vmem>>, vector<16x2xf32>
    tpu.vector_store %arg6[%c0_11, %c0_12], %15 {strides = array<i32>} : memref<16x2xf32, #tpu.memory_space<vmem>>, vector<16x2xf32>,
    return
  }
  func.func @transform_0(%arg0: i32) -> (i32, i32) {
    %c0_i32 = arith.constant 0 : i32
    %c0_i32_0 = arith.constant 0 : i32
    return %arg0, %c0_i32 : i32, i32
  }
  func.func @transform_1(%arg0: i32) -> (i32, i32) {
    %c0_i32 = arith.constant 0 : i32
    %c0_i32_0 = arith.constant 0 : i32
    %c0_i32_1 = arith.constant 0 : i32
    return %c0_i32, %c0_i32_0 : i32, i32
  }
  func.func @transform_2(%arg0: i32) -> (i32, i32) {
    %c0_i32 = arith.constant 0 : i32
    %c0_i32_0 = arith.constant 0 : i32
    %c0_i32_1 = arith.constant 0 : i32
    return %c0_i32, %c0_i32_0 : i32, i32
  }
  func.func @transform_3(%arg0: i32) -> (i32, i32) {
    %c0_i32 = arith.constant 0 : i32
    %c0_i32_0 = arith.constant 0 : i32
    %c0_i32_1 = arith.constant 0 : i32
    return %c0_i32, %c0_i32_0 : i32, i32
  }
  func.func @transform_4(%arg0: i32) -> (i32, i32) {
    %c0_i32 = arith.constant 0 : i32
    %c0_i32_0 = arith.constant 0 : i32
    %c0_i32_1 = arith.constant 0 : i32
    return %c0_i32, %c0_i32_0 : i32, i32
  }
  func.func @transform_5(%arg0: i32) -> (i32, i32) {
    %c0_i32 = arith.constant 0 : i32
    %c0_i32_0 = arith.constant 0 : i32
    return %arg0, %c0_i32 : i32, i32
  }
}

</mosaic_0001>

<bundles_post_ra>
// kernel: tpu_custom_call.1
= control target key start
LH: loop header
LB: loop body
LE: loop exit
PB: predicated region body
PF: predicated region fallthrough
CT: control target
= control target key end

     0   :  { %10 = vsyncpa [#allocation3], 0  ;;  %s1574_s0 = inlined_call_operand.hbm [shape: f32[40,256], index: 0, kind: input, shape index: {}]   ;;  %s1575_s1 = inlined_call_operand.hbm [shape: bf16[256,128], index: 1, kind: input, shape index: {}]   ;;  %s1576_s2 = inlined_call_operand.vmem [shape: f32[1,128], index: 2, kind: input, shape index: {}]   ;;  %s1577_s3 = inlined_call_operand.hbm [shape: bf16[128,128], index: 3, kind: input, shape index: {}]   ;;  %s1578_s4 = inlined_call_operand.vmem [shape: f32[1,128], index: 4, kind: input, shape index: {}]   ;;  %s1579_s5 = inlined_call_operand.vmem [shape: f32[40,2], index: 5, kind: output, shape index: {}]  }
   0x1   :  { %12 = vsyncpa [#allocation3 + $0x1], 0 }
   0x2   :  { %13 = vsyncpa [#allocation5], 0  ;;  %s1331_s18 = smov 0   ;;  %s1333_s19 = smov 0  }
   0x3   :  { %s1335_s20 = smov 0   ;;  %s1337_s21 = smov 0  }
   0x4 LB: > { %s1350_s22 = sadd.s32 4294967295, %s1258_s21   ;;  %s1353_s23 = sadd.s32 1, %s1258_s21   ;;  %s1258_s21 = sphi %s1337_s21, %s1597_s21   ;;  %s1254_s20 = sphi %s1335_s20, %s1596_s20   ;;  %s1250_s19 = sphi %s1333_s19, %s1595_s19   ;;  %s1246_s18 = sphi %s1331_s18, %s1594_s18  }
   0x5   : > { %s23_s24 = ssub.s32 %s1258_s21, %s1353_s23  ;;  %s26_s25 = sadd.s32 1, %s1254_s20 }
   0x6   : > { %p24_p0 = scmp.eq.s32.totalorder %s23_s24, 0  ;;  %p33_p1 = scmp.ne.s32.totalorder %s1254_s20, %s1250_s19 }
   0x7   : > { %p34_p2 = scmp.eq.s32.totalorder %s1258_s21, 0  ;;  %p39_p3 = scmp.ne.s32.totalorder %s1250_s19, %s1246_s18 }
   0x8   : > { %s1363_s26 = scalar_select %p24_p0, %s1254_s20, %s26_s25  }
   0x9   : > { %p1365_p4 = por %p34_p2, %p33_p1  ;;  %p1580_p5 = scmp.eq.s32.totalorder %s1350_s22, 0 }
   0xa   : > { %p147_p6 = scmp.eq.s32.totalorder %s1350_s22, 2  ;;  %p838_p7 = scmp.ge.s32.totalorder %s1258_s21, 1 }
   0xb   : > { %s1583_s27 = scalar_select %p1365_p4, 1, 0 }
   0xc   : > { %p1374_p8 = por %p1580_p5, %p39_p3  ;;  %p160_p9 = scmp.lt.s32.totalorder %s1258_s21, 4 }
   0xd   : > { %p1379_p10 = por %p147_p6, %p33_p1  ;;  %s1292_s6 = smov [#allocation4]  }
   0xe   : > { %s1584_s28 = scalar_select %p1374_p8, 1, 0 }
   0xf   : > { %s1585_s29 = scalar_select %p1379_p10, 1, 0 }
  0x10   : > { %p1383_p11 = pnand %p838_p7, %p160_p9  ;;  %s172_s7 = sshll.u32 %s1292_s6, 4  ;;  %s173_s7 = int_to_ptr.vmem [resolvable:$true] %s172_s7 }
  0x11   : > { %s1293_s9 = smov [#allocation6]   ;;  %s1104_s13 = scalar_lea.hbm %s1575_s1, 2048 }
  0x12   : > { %s1586_s30 = scalar_select %p1383_p11, 1, 0 }
  0x13   : > { %p965_p12 = pneg %p1383_p11  ;;  %s188_s10 = sshll.u32 %s1293_s9, 4  ;;  %s1395_s10 = int_to_ptr.vmem [resolvable:$true] %s188_s10 }
  0x14   : > { %p1105_p0 = scmp.ne.s32.totalorder %s1575_s1, %s1104_s13  ;;  %p1111_p6 = scmp.lt.u32.totalorder %s1104_s13, %s1575_s1 }
  0x15   : > { %p1391_p13 = pnand %p965_p12, %p1580_p5 }
  0x17   : > { %p1106_p1 = pneg %p1391_p13 }
  0x19   : > { %p1107_p2 = pnand %p1106_p1, %p1105_p0 }
  0x1b   : > { %p1108_p3 = pneg %p1107_p2 }
  0x1d   : > { %p1113_p7 = pnand %p1111_p6, %p1108_p3 }
  0x1f   : > { %1116 = shalt.err (!%p1113_p7)
}
  0x20   : > { %s1117_s18 = scalar_lea.vmem %s173_s7, 2048  ;;  %p1125_p10 = scmp.lt.s32.totalorder %s173_s7, %s173_s7 }
  0x21   : > { %p1118_p9 = scmp.ne.s32.totalorder %s173_s7, %s1117_s18  ;;  %p1126_p8 = scmp.lt.s32.totalorder %s1117_s18, %s1117_s18 }
  0x23   : > { %p1120_p12 = pnand %p1118_p9, %p1106_p1  ;;  %p1127_p11 = por %p1126_p8, %p1125_p10 }
  0x25   : > { %p1121_p5 = pneg %p1120_p12 }
  0x27   : > { %p1128_p4 = pnand %p1127_p11, %p1121_p5 }
  0x29   : > { %1131 = shalt.err (!%p1128_p4)
}
  0x2a   : > { %s1294_s24 = smov 64   ;;  %s1295_s25 = smov 4  }
  0x2b   : > { %968 = dma.hbm_to_vmem [thread:$0]  (!%p1391_p13), %s1575_s1, 2048, %s173_s7, [#allocation5], %s1294_s24, %s1294_s24, %s1295_s25  }
  0x2c   : > { %s1132_s13 = scalar_lea.hbm %s1577_s3, 1024 }
  0x2d   : > { %p1133_p0 = scmp.ne.s32.totalorder %s1577_s3, %s1132_s13  ;;  %p1139_p8 = scmp.lt.u32.totalorder %s1132_s13, %s1577_s3 }
  0x2f   : > { %p1135_p4 = pnand %p1133_p0, %p1106_p1 }
  0x31   : > { %p1136_p5 = pneg %p1135_p4 }
  0x33   : > { %p1141_p10 = pnand %p1139_p8, %p1136_p5 }
  0x35   : > { %1144 = shalt.err (!%p1141_p10)
}
  0x36   : > { %s1145_s7 = scalar_lea.vmem %s1395_s10, 1024  ;;  %p1153_p6 = scmp.lt.s32.totalorder %s1395_s10, %s1395_s10 }
  0x37   : > { %p1146_p11 = scmp.ne.s32.totalorder %s1395_s10, %s1145_s7  ;;  %p1154_p7 = scmp.lt.s32.totalorder %s1145_s7, %s1145_s7 }
  0x39   : > { %p1148_p2 = pnand %p1146_p11, %p1106_p1  ;;  %p1155_p9 = por %p1154_p7, %p1153_p6 }
  0x3b   : > { %p1149_p3 = pneg %p1148_p2 }
  0x3d   : > { %p1156_p12 = pnand %p1155_p9, %p1149_p3 }
  0x3f   : > { %1159 = shalt.err (!%p1156_p12)
}
  0x40   : > { %971 = dma.hbm_to_vmem [thread:$0]  (!%p1391_p13), %s1577_s3, 1024, %s1395_s10, [#allocation5], %s1294_s24, %s1294_s24, %s1295_s25  }
  0x41   : > { %p841_p0 = scmp.ge.s32.totalorder %s1258_s21, 3 }
  0x42   : > { %p1588_p4 = scmp.ne.s32.totalorder (!%p841_p0), %s1583_s27, 0 }
  0x43   : > { %201 = sbr.rel (%p841_p0) target bundleno = 109 (0x6d), region = 32 }
  0x4a   : > { %204 = sbr.rel (!%p1588_p4) target bundleno = 109 (0x6d), region = 36  ;;  %s205_s9 = sand.u32 (%p1588_p4), 1, %s1254_s20  }
  0x4b   : > { %s843_s11 = sshll.u32 (%p1588_p4), %s1258_s21, 1  ;;  %s842_s12 = sshll.u32 (%p1588_p4), %s205_s9, 5 }
  0x4c   : > { %s211_s13 = ssub.s32 (%p1588_p4), 5, %s843_s11  ;;  %s1452_s15 = scalar_lea.sflag (%p1588_p4), [#allocation3], %s205_s9 }
  0x4d   : > { %p212_p1 = scmp.lt.s32.totalorder (%p1588_p4), %s211_s13, 2  ;;  %s209_s10 = scalar_lea.vmem (%p1588_p4), [#allocation2], %s842_s12 }
  0x51   : > { %s1599_s13 = smov (!%p212_p1, %s211_s13), 2 }
  0x52   : > { %s1449_s8 = sshll.u32 %s1599_s13, 8 }
  0x53   : > { %s217_s14 = ssub.s32 512, %s1449_s8 }
  0x54   : > { %218 = vsyncadd %s1452_s15, %s217_s14  ;;  %p846_p13 = scmp.ne.s32.totalorder %s1449_s8, 0  ;;  %s901_s27 = sshll.u32 %s1258_s21, 9 }
  0x55   : > { %s1460_s16 = scalar_lea.hbm %s1574_s0, %s901_s27  ;;  %s224_s17 = sshll.u32 %s209_s10, 4  ;;  %s1462_s17 = int_to_ptr.vmem [resolvable:$true] %s224_s17 }
  0x56   : > { %s1160_s7 = scalar_lea.hbm %s1460_s16, %s1449_s8  ;;  %s1164_s21 = scalar_lea.hbm %s1574_s0, 1280 }
  0x57   : > { %p1161_p5 = scmp.ne.s32.totalorder %s1460_s16, %s1160_s7  ;;  %p1165_p11 = scmp.lt.u32.totalorder %s1460_s16, %s1574_s0 }
  0x58   : > { %p1166_p2 = scmp.lt.u32.totalorder %s1164_s21, %s1160_s7  ;;  %p1168_p6 = scmp.lt.u32.totalorder %s1160_s7, %s1460_s16 }
  0x59   : > { %p1162_p8 = pnand %p1161_p5, %p846_p13 }
  0x5a   : > { %p1167_p3 = por %p1166_p2, %p1165_p11 }
  0x5b   : > { %p1163_p10 = pneg %p1162_p8 }
  0x5c   : > { %p1169_p7 = por %p1168_p6, %p1167_p3 }
  0x5e   : > { %p1170_p9 = pnand %p1169_p7, %p1163_p10 }
  0x60   : > { %1173 = shalt.err (!%p1170_p9)
}
  0x61   : > { %s1174_s12 = scalar_lea.vmem %s1462_s17, %s1449_s8  ;;  %s1296_s13 = smov [#allocation2]  }
  0x62   : > { %p1175_p12 = scmp.ne.s32.totalorder %s1462_s17, %s1174_s12  ;;  %s1178_s14 = sshll.u32 %s1296_s13, 4  ;;  %s1179_s14 = int_to_ptr.vmem [resolvable:$false] %s1178_s14 }
  0x63   : > { %s1180_s10 = scalar_lea.vmem %s1179_s14, 1024  ;;  %p1181_p1 = scmp.lt.s32.totalorder %s1462_s17, %s1179_s14 }
  0x64   : > { %p1176_p0 = pnand %p1175_p12, %p846_p13  ;;  %p1182_p5 = scmp.lt.s32.totalorder %s1180_s10, %s1174_s12 }
  0x66   : > { %p1177_p4 = pneg %p1176_p0  ;;  %p1183_p8 = por %p1182_p5, %p1181_p1 }
  0x68   : > { %p1184_p11 = pnand %p1183_p8, %p1177_p4 }
  0x6a   : > { %1187 = shalt.err (!%p1184_p11)
}
  0x6b   : > { %s1297_s27 = smov 256   ;;  %s1298_s24 = smov 16  }
  0x6c   : > { %230 = dma.hbm_to_vmem [thread:$0]  (%p846_p13), %s1460_s16, %s1449_s8, %s1462_s17, %s1452_s15, %s1297_s27, %s1297_s27, %s1298_s24  }
  0x6d PF: > { %p1589_p10 = scmp.ne.s32.totalorder %s1586_s30, 0 }
  0x6e   : > { %s1492_s25 = sand.u32 (!%p1589_p10), 1, %s1250_s19   ;;  %p1590_p2 = scmp.ne.s32.totalorder (!%p1589_p10), %s1584_s28, 0 }
  0x6f   : > { %236 = sbr.rel (%p1589_p10) target bundleno = 644 (0x284), region = 40  ;;  %s852_s7 = sshll.u32 (!%p1589_p10), %s1492_s25, 5 }
  0x70   : > { %s239_s18 = scalar_lea.sflag (!%p1589_p10), [#allocation3], %s1492_s25  ;;  %s1496_s6 = scalar_lea.vmem (!%p1589_p10), [#allocation2], %s852_s7 }
  0x76   : > { %1237 = dma.done.wait (%p1590_p2), %s239_s18, 512  }
  0x77   : > { %1239 = vsyncadd (%p1590_p2), %s239_s18, 4294966784  ;;  %p1591_p13 = scmp.eq.s32.totalorder %s1350_s22, 0 }
  0x79   : > { %1241 = dma.done.wait (%p1591_p13), [#allocation5], 3072   ;;  %p1592_p3 = pmov %p1591_p13 }
  0x7a   : > { %v1299_v0 = vmov 0.0   ;;  %v1080_v1 = vld [vmem:[#allocation4 + $0x40] sm:$0xff]   ;;  %v1082_v3 = vld [vmem:[#allocation4 + $0x48] sm:$0xff]   ;;  %v1084_v5 = vld [vmem:[#allocation4 + $0x50] sm:$0xff]   ;;  %vm1300_vm0 = vmmov 0   ;;  %s855_s8 = sshll.u32 %s1492_s25, 4 }
  0x7b   : > { %1243 = vsyncadd (%p1592_p3), [#allocation5], 4294964224  ;;  %936 = vmatprep.subr.bf16.mxu1 %v1299_v0  ;;  %v1081_v2 = vld [vmem:[#allocation4] sm:$0xff]   ;;  %905 = vmatprep.subr.bf16.mxu0 %v1080_v1  ;;  %v1083_v4 = vld [vmem:[#allocation4 + $0x8] sm:$0xff]   ;;  %vm585_vm1 = vcmask 15360   ;;  %s1526_s17 = scalar_lea.vmem [#allocation7], %s855_s8  }
  0x7c   : > { %906 = vmatpush3.bf16.msra.mxu0 %v1081_v2  ;;  %v1085_v6 = vld [vmem:[#allocation4 + $0x10] sm:$0xff]   ;;  %v1086_v7 = vld [vmem:[#allocation4 + $0x58] sm:$0xff]   ;;  %v1088_v9 = vld [vmem:[#allocation4 + $0x60] sm:$0xff]   ;;  %952 = vmatprep.mubr.msk.bf16.mxu1 %vm1300_vm0, %v1299_v0  ;;  %p1593_p6 = scmp.ne.s32.totalorder %s1585_s29, 0 }
  0x7d   : > { %907 = vmatprep.subr.bf16.mxu0 %v1082_v3  ;;  %v1087_v8 = vld [vmem:[#allocation4 + $0x18] sm:$0xff]   ;;  %v1089_v10 = vld [vmem:[#allocation4 + $0x20] sm:$0xff]   ;;  %v1090_v11 = vld [vmem:[#allocation4 + $0x68] sm:$0xff]   ;;  %s883_s21 = sshll.u32 (%p1593_p6), %s1350_s22, 1  ;;  %s902_s9 = sshll.u32 (%p1593_p6), %s1350_s22, 4 }
  0x7e   : > { %v289_v12 = vld [vmem:[%s1496_s6 + $0x8] sm:$0xff]  ;;  %v291_v13 = vld [vmem:[%s1496_s6 + $0x18] sm:$0xff]  ;;  %v1096_v16 = vld [vmem:[#allocation6] sm:$0xff]   ;;  %s596_s11 = ssub.s32 (%p1593_p6), 5, %s883_s21  ;;  %s1537_s14 = scalar_lea.vmem (%p1593_p6), %s1579_s5, %s902_s9  }
  0x7f   : > { %v1091_v14 = vld [vmem:[#allocation4 + $0x28] sm:$0xff]   ;;  %v293_v15 = vpack.c.bf16 %v291_v13, %v289_v12  ;;  %v1092_v17 = vld [vmem:[#allocation4 + $0x70] sm:$0xff]   ;;  %937 = vmatpush3.bf16.msra.mxu1 %v1096_v16  ;;  %v1094_v20 = vld [vmem:[#allocation4 + $0x78] sm:$0xff]   ;;  %p597_p7 = scmp.lt.s32.totalorder (%p1593_p6), %s596_s11, 2 }
  0x80   : > { %908 = vmatpush3.bf16.msra.mxu0 %v1083_v4  ;;  %v1097_v18 = vld [vmem:[#allocation6 + $0x8] sm:$0xff]   ;;  %938 = vmatprep.subr.bf16.mxu1 %v1299_v0  ;;  %v1093_v19 = vld [vmem:[#allocation4 + $0x30] sm:$0xff]   ;;  %v1095_v22 = vld [vmem:[#allocation4 + $0x38] sm:$0xff]  }
  0x81   : > { %909 = vmatprep.subr.bf16.mxu0 %v1084_v5  ;;  %461 = vmatprep.mubr.bf16.mxu0 %v293_v15  ;;  %v1098_v21 = vld [vmem:[#allocation6 + $0x10] sm:$0xff]   ;;  %v288_v23 = vld [vmem:[%s1496_s6] sm:$0xff]  ;;  %v1099_v25 = vld [vmem:[#allocation6 + $0x18] sm:$0xff]  }
  0x82   : > { %v290_v24 = vld [vmem:[%s1496_s6 + $0x10] sm:$0xff]  ;;  %v1100_v27 = vld [vmem:[#allocation6 + $0x20] sm:$0xff]   ;;  %v1101_v28 = vld [vmem:[#allocation6 + $0x28] sm:$0xff]  }
  0x83   : > { %939 = vmatpush3.bf16.msra.mxu1 %v1097_v18  ;;  %v292_v26 = vpack.c.bf16 %v290_v24, %v288_v23  ;;  %v1102_v29 = vld [vmem:[#allocation6 + $0x30] sm:$0xff]   ;;  %v1103_v30 = vld [vmem:[#allocation6 + $0x38] sm:$0xff]   ;;  %v856_v32 = vld [vmem:[%s1576_s2] ss:$0 sm:$0xff] }
  0x84   : > { %910 = vmatpush3.bf16.msra.mxu0 %v1085_v6  ;;  %940 = vmatprep.subr.bf16.mxu1 %v1299_v0  ;;  %v873_v43 = vld [vmem:[%s1578_s4] ss:$0 sm:$0xff] }
  0x85   : > { %911 = vmatprep.subr.bf16.mxu0 %v1086_v7 }
  0x87   : > { %941 = vmatpush3.bf16.msra.mxu1 %v1098_v21 }
  0x88   : > { %912 = vmatpush3.bf16.msra.mxu0 %v1087_v8  ;;  %942 = vmatprep.subr.bf16.mxu1 %v1299_v0 }
  0x89   : > { %913 = vmatprep.subr.bf16.mxu0 %v1088_v9 }
  0x8b   : > { %943 = vmatpush3.bf16.msra.mxu1 %v1099_v25 }
  0x8c   : > { %914 = vmatpush3.bf16.msra.mxu0 %v1089_v10  ;;  %944 = vmatprep.subr.bf16.mxu1 %v1299_v0 }
  0x8d   : > { %915 = vmatprep.subr.bf16.mxu0 %v1090_v11 }
  0x8f   : > { %945 = vmatpush3.bf16.msra.mxu1 %v1100_v27 }
  0x90   : > { %916 = vmatpush3.bf16.msra.mxu0 %v1091_v14  ;;  %946 = vmatprep.subr.bf16.mxu1 %v1299_v0 }
  0x91   : > { %917 = vmatprep.subr.bf16.mxu0 %v1092_v17 }
  0x93   : > { %947 = vmatpush3.bf16.msra.mxu1 %v1101_v28 }
  0x94   : > { %918 = vmatpush3.bf16.msra.mxu0 %v1093_v19  ;;  %948 = vmatprep.subr.bf16.mxu1 %v1299_v0 }
  0x95   : > { %919 = vmatprep.subr.bf16.mxu0 %v1094_v20 }
  0x97   : > { %949 = vmatpush3.bf16.msra.mxu1 %v1102_v29 }
  0x98   : > { %920 = vmatpush3.bf16.msra.mxu0 %v1095_v22  ;;  %950 = vmatprep.subr.bf16.mxu1 %v1299_v0 }
  0x9b   : > { %462 = vmatmul.mubr.bf16.vlgmr.msra.gmra.mrb[0].mxu0 %v292_v26  ;;  %951 = vmatpush3.bf16.msra.mxu1 %v1103_v30 }
 0x16e   : > { %v921_v31 = vpop.f32.mrb[0].mxu0 }
 0x16f   : > { %v922_v33 = vpop.f32.mrb[1].mxu0 }
 0x170   : > { %v923_v34 = vadd.f32 %v922_v33, %v921_v31  ;;  %v924_v35 = vpop.f32.mrb[2].mxu0 }
 0x171   : > { %v925_v36 = vpop.f32.mrb[3].mxu0 }
 0x172   : > { %v464_v37 = vadd.f32 %v923_v34, %v856_v32  ;;  %v926_v38 = vadd.f32 %v925_v36, %v924_v35 }
 0x174   : > { %v467_v39 = vadd.f32 %v926_v38, %v856_v32  ;;  %v470_v40 = vmax.f32 %v464_v37, 0.0 }
 0x176   : > { %v471_v41 = vmax.f32 %v467_v39, 0.0 }
 0x178   : > { %v472_v42 = vpack.c.bf16 %v471_v41, %v470_v40 }
 0x17a   : > { %953 = vmatmul.mubr.bf16.vlgmr.msra.gmra.mrb[0].mxu1 %v472_v42 }
 0x24c   : > { %594 = sbr.rel (!%p1593_p6) target bundleno = 644 (0x284), region = 56 }
 0x24d   : > { %v578_v44 = vpop.f32.mrb[0].mxu1 }
 0x24e   : > { %v579_v45 = vadd.f32 %v873_v43, %v578_v44  ;;  %v954_v46 = vpop.f32.mrb[1].mxu1 }
 0x24f   : > { %v581_v47 = vpop.f32.mrb[2].mxu1 }
 0x250   : > { %586 = vst.msk [vmem:[%s1526_s17] sm:$0xff] %vm585_vm1, %v579_v45  ;;  %v582_v48 = vadd.f32 %v873_v43, %v581_v47  ;;  %v955_v49 = vpop.f32.mrb[3].mxu1 }
 0x252   : > { %587 = vst.msk [vmem:[%s1526_s17 + $0x8] sm:$0xff] %vm585_vm1, %v582_v48 }
 0x253   : > { %s1601_s11 = smov (!%p597_p7, %s596_s11), 2 }
 0x254   : > { %s884_s10 = sshll.u32 %s1601_s11, 7 }
 0x255   : > { %p887_p9 = scmp.eq.s32.totalorder %s884_s10, 0 }
 0x256   : > { %s1543_s29 = sshrl.u32 (!%p887_p9), %s1601_s11, 1 }
 0x257   : > { %605 = sbr.rel (%p887_p9) target bundleno = 644 (0x284), region = 60  ;;  %p888_p12 = scmp.le.s32.totalorder (!%p887_p9), %s1543_s29, 0 }
 0x25e   : > { %772 = sbr.rel (%p888_p12) target bundleno = 623 (0x26f), region = 142  ;;  %s1260_s22 = smov (!%p888_p12), %s1537_s14  }
 0x25f   : > { %s1264_s27 = smov (!%p888_p12), %s1526_s17   ;;  %s1268_s24 = smov (!%p888_p12), 0  }
 0x260   : > { %s1272_s25 = smov (!%p888_p12), 0  }
 0x265 LB: >> { %v669_v50 = vld [vmem:[%s1266_s27] sm:$0xff]  ;;  %v671_v51 = vld [vmem:[%s1266_s27 + $0x8] sm:$0xff]  ;;  %s673_s7 = sadd.s32 1, %s1270_s24  ;;  %s663_s25 = sadd.s32 1, %s1274_s25   ;;  %s1274_s25 = sphi %s1272_s25, %s663_s25   ;;  %s1270_s24 = sphi %s1268_s24, %s1269_s24   ;;  %s1266_s27 = sphi %s1264_s27, %s678_s27   ;;  %s1262_s22 = sphi %s1260_s22, %s679_s22  }
 0x266   : >> { %670 = vst [vmem:[%s1262_s22] sm:$0xff] %v669_v50  ;;  %672 = vst [vmem:[%s1262_s22 + $0x8] sm:$0xff] %v671_v51  ;;  %p674_p0 = scmp.ge.s32.totalorder %s673_s7, %s1543_s29  ;;  %p662_p4 = scmp.ge.s32.totalorder %s663_s25, %s1543_s29 }
 0x268   : >> { %s1603_s7 = smov (%p674_p0, %s673_s7), 0  ;;  %665 = sbr.rel (!%p662_p4) target bundleno = 613 (0x265), region = 148 }
 0x269   : >> { %s889_s18 = sshll.u32 %s1603_s7, 4  ;;  %s1269_s24 = smov %s1603_s7  }
 0x26a   : >> { %s678_s27 = scalar_lea.vmem %s1526_s17, %s889_s18 [#allocation7]   ;;  %s679_s22 = scalar_lea.vmem %s1537_s14, %s889_s18  }
 0x26f PF: > { %s1553_s6 = sand.u32 1, %s1601_s11   ;;  %s903_s28 = sshll.u32 %s1543_s29, 4 }
 0x270   : > { %s684_s30 = scalar_lea.vmem %s1526_s17, %s903_s28 [#allocation7]   ;;  %s686_s8 = scalar_lea.vmem %s1537_s14, %s903_s28  }
 0x271   : > { %p894_p1 = scmp.le.s32.totalorder %s1553_s6, 0 }
 0x272   : > { %s1276_s15 = smov (!%p894_p1), %s686_s8   ;;  %s1280_s16 = smov (!%p894_p1), %s684_s30  }
 0x273   : > { %786 = sbr.rel (%p894_p1) target bundleno = 644 (0x284), region = 153  ;;  %s1284_s21 = smov (!%p894_p1), 0  }
 0x274   : > { %s1288_s9 = smov (!%p894_p1), 0  }
 0x27a LB: >> { %v696_v52 = vld [vmem:[%s1282_s16] sm:$0xff]  ;;  %s698_s11 = sadd.s32 1, %s1286_s21  ;;  %s690_s9 = sadd.s32 1, %s1290_s9   ;;  %s1290_s9 = sphi %s1288_s9, %s690_s9   ;;  %s1286_s21 = sphi %s1284_s21, %s1285_s21   ;;  %s1282_s16 = sphi %s1280_s16, %s703_s16   ;;  %s1278_s15 = sphi %s1276_s15, %s704_s15  }
 0x27b   : >> { %697 = vst [vmem:[%s1278_s15] sm:$0xff] %v696_v52  ;;  %p699_p5 = scmp.ge.s32.totalorder %s698_s11, %s1553_s6  ;;  %p689_p8 = scmp.ge.s32.totalorder %s690_s9, %s1553_s6 }
 0x27d   : >> { %s1605_s11 = smov (%p699_p5, %s698_s11), 0  ;;  %692 = sbr.rel (!%p689_p8) target bundleno = 634 (0x27a), region = 159 }
 0x27e   : >> { %s895_s17 = sshll.u32 %s1605_s11, 3  ;;  %s1285_s21 = smov %s1605_s11  }
 0x27f   : >> { %s703_s16 = scalar_lea.vmem %s684_s30, %s895_s17 [#allocation7]   ;;  %s704_s15 = scalar_lea.vmem %s686_s8, %s895_s17  }
 0x284 PF: > { %p16_p11 = scmp.ge.s32.totalorder %s1353_s23, 5   ;;  %s1594_s18 = smov %s1250_s19 }
 0x285   : > { %s1595_s19 = smov %s1254_s20  ;;  %s1596_s20 = smov %s1363_s26 }
 0x286   : > { %s1597_s21 = smov %s1353_s23  ;;  %18 = sbr.rel (!%p16_p11) target bundleno = 4 (0x4), region = 170 }
 0x28d   :  { %720 = vsyncpa [#allocation3], 1 }
 0x28e   :  { %722 = vsyncpa [#allocation3 + $0x1], 1 }
 0x28f   :  { %723 = vsyncpa [#allocation5], 1 }

</bundles_post_ra>
